<compile_context>
chip_gen: v6e
topology: v6e:2x2x1
jax: 0.10.0
libtpu: 0.0.40
codegen_flags: <defaults>
</compile_context>

<pallas_src>
import functools
import math

import jax
import jax.numpy as jnp
import numpy as np
from jax.experimental import pallas as pl
from jax.experimental.pallas import tpu as pltpu


def _build_pe_table(d_model: int, max_seq_len: int = 80) -> jnp.ndarray:
    """Vectorized, exact reproduction of the PyTorch __init__ double loop."""
    assert d_model % 2 == 0, "d_model must be even (the PyTorch module assumes this)"
    pos = np.arange(max_seq_len, dtype=np.float64)[:, None]            # (S, 1)
    j = np.arange(d_model, dtype=np.float64)[None, :]                  # (1, D)
    # Every column j uses exponent 2*j/d_model; sin on even, cos on odd columns.
    angle = pos / np.power(10000.0, 2.0 * j / d_model)
    pe = np.where((np.arange(d_model) % 2)[None, :] == 0, np.sin(angle), np.cos(angle))
    return jnp.asarray(pe, dtype=jnp.float32)                          # (max_seq_len, d_model)


def _pe_kernel(x_ref, pe_ref, o_ref, *, scale):
    # x_ref / o_ref : (TB, TS, D_f) blocks of x / out
    # pe_ref        : (TS, D_f) float32 block, shared across the batch axis
    x = x_ref[...].astype(jnp.float32)
    o_ref[...] = (x * scale + pe_ref[...][None, :, :]).astype(o_ref.dtype)


def _vmem_budgets():
    """(per-step block budget, vmem_limit_bytes), generation-aware."""
    cap = 64 * 1024 * 1024                       # v7x per-TensorCore worst case
    try:
        info = pltpu.get_tpu_info()
        cap = int(getattr(info, "vmem_capacity_bytes", cap)) or cap
    except Exception:
        pass
    cap = max(cap, 16 * 1024 * 1024)
    return cap // 8, cap // 2


def _plan(B, S, D, itemsize):
    """Layout + tiling plan (pure Python, shapes only)."""
    # ---- lane-dense fold for narrow d_model --------------------------------
    r, S_pad = 1, S
    if D < 128:
        r = 128 // math.gcd(D, 128)
        S_pad = -(-S // r) * r                   # pad seq so the fold is exact
        while S_pad % (2 * r) == 0 and 2 * r * D <= 4096:
            r *= 2
    S_f, D_f = S_pad // r, r * D
    # NOTE: D >= 128 with D % 128 != 0 is intentionally left un-padded (the block
    # last dim equals the full array dim so it lowers fine; padding D would cost
    # a full extra copy of x, more than the masked-store penalty when mem-bound).

    # ---- VMEM-budgeted tile sizes -------------------------------------------
    budget, vmem_limit = _vmem_budgets()
    align = max(8, 32 // itemsize)               # 8 f32 / 16 bf16 / 32 int8-fp8 rows
    x_row = D_f * itemsize
    pe_row = D_f * 4                             # pe kept in f32
    # TB = 1 baseline: double-buffered x + out blocks and the pe block per step.
    max_ts = max(1, budget // (2 * (2 * x_row + pe_row)))
    if max_ts >= S_f:
        TS = S_f
    else:
        TS = min(S_f, max(align, (max_ts // align) * align))
    # Grow the batch block with the leftover budget to amortize per-step cost.
    per_batch = 2 * 2 * TS * x_row
    TB = max(1, (budget - 2 * TS * pe_row) // per_batch)
    TB = min(TB, B)
    num_s_tiles = -(-S_f // TS)
    if num_s_tiles == 1 and B > 1:
        # Keep >= 2 parallel grid steps so both v7x TensorCores participate.
        TB = min(TB, -(-B // 2))
    num_b_tiles = -(-B // TB)
    return dict(r=r, S_pad=S_pad, S_f=S_f, D_f=D_f, TB=TB, TS=TS,
                num_s_tiles=num_s_tiles, num_b_tiles=num_b_tiles,
                vmem_limit=vmem_limit)


def positional_encoder_forward(x, pe_table, pe_cache=None):
    """out = x * sqrt(d_model) + pe_table[:seq_len] (broadcast over batch)."""
    B, S, D = x.shape
    assert D == pe_table.shape[1], "d_model mismatch"
    assert S <= pe_table.shape[0], "sequence longer than max_seq_len"
    itemsize = jnp.dtype(x.dtype).itemsize
    scale = math.sqrt(D)
    p = _plan(B, S, D, itemsize)
    S_pad, S_f, D_f, TB, TS = p["S_pad"], p["S_f"], p["D_f"], p["TB"], p["TS"]

    # pe in kernel layout (fp32), cached per seq_len so it is not rebuilt per call.
    key = (S, S_pad, D_f)
    pe_k = None if pe_cache is None else pe_cache.get(key)
    if pe_k is None:
        pe_k = pe_table[:S]
        if S_pad > S:
            pe_k = jnp.pad(pe_k, ((0, S_pad - S), (0, 0)))
        pe_k = pe_k.reshape(S_f, D_f)
        if pe_cache is not None:
            pe_cache[key] = pe_k

    x_k = x
    if S_pad > S:
        x_k = jnp.pad(x_k, ((0, 0), (0, S_pad - S), (0, 0)))
    x_k = x_k.reshape(B, S_f, D_f)

    # Batch innermost: pe's block index is constant across consecutive steps.
    grid = (p["num_s_tiles"], p["num_b_tiles"])

    out = pl.pallas_call(
        functools.partial(_pe_kernel, scale=scale),
        out_shape=jax.ShapeDtypeStruct((B, S_f, D_f), x.dtype),
        grid_spec=pltpu.PrefetchScalarGridSpec(
            num_scalar_prefetch=0,
            grid=grid,
            in_specs=[
                pl.BlockSpec((TB, TS, D_f), lambda s, b: (b, s, 0)),
                pl.BlockSpec((TS, D_f), lambda s, b: (s, 0)),
            ],
            out_specs=pl.BlockSpec((TB, TS, D_f), lambda s, b: (b, s, 0)),
        ),
        compiler_params=pltpu.CompilerParams(
            dimension_semantics=("parallel", "parallel"),
            vmem_limit_bytes=p["vmem_limit"],
        ),
        cost_estimate=pl.CostEstimate(
            flops=2 * B * S_pad * D,
            transcendentals=0,
            bytes_accessed=2 * B * S_pad * D * itemsize + S_pad * D * 4,
        ),
    )(x_k, pe_k)

    out = out.reshape(B, S_pad, D)
    if S_pad > S:
        out = out[:, :S, :]
    return out


class PositionalEncoder:
    """JAX/Pallas equivalent of the PyTorch PositionalEncoder module."""

    def __init__(self, d_model, max_seq_len=80):
        self.d_model = d_model
        self.pe = _build_pe_table(d_model, max_seq_len)   # fp32 buffer, as in PyTorch
        self._pe_cache = {}                               # kernel-layout pe per seq_len

    def __call__(self, x):
        return positional_encoder_forward(x, self.pe, self._pe_cache)


if __name__ == "__main__":
    key = jax.random.PRNGKey(0)
    B = 2

    # Case 1: narrow d_model -> lane-dense folded path.
    enc = PositionalEncoder(d_model=32, max_seq_len=80)
    S = 8
    x = jax.random.normal(key, (B, S, 32), dtype=jnp.float32)
    out = jax.block_until_ready(enc(x))
    ref = x * math.sqrt(32) + enc.pe[None, :S, :]
    np.testing.assert_allclose(np.asarray(out), np.asarray(ref), rtol=1e-6, atol=1e-6)

    # Case 2: seq not divisible by the fold factor -> pad-and-slice path.
    S3 = 7
    x3 = jax.random.normal(jax.random.PRNGKey(2), (B, S3, 32), dtype=jnp.float32)
    out3 = jax.block_until_ready(enc(x3))
    ref3 = x3 * math.sqrt(32) + enc.pe[None, :S3, :]
    np.testing.assert_allclose(np.asarray(out3), np.asarray(ref3), rtol=1e-6, atol=1e-6)

    # Case 3: d_model >= 128 -> direct batch+seq blocked path.
    enc2 = PositionalEncoder(d_model=128, max_seq_len=32)
    S2 = 16
    x2 = jax.random.normal(jax.random.PRNGKey(1), (B, S2, 128), dtype=jnp.float32)
    out2 = jax.block_until_ready(enc2(x2))
    ref2 = x2 * math.sqrt(128) + enc2.pe[None, :S2, :]
    np.testing.assert_allclose(np.asarray(out2), np.asarray(ref2), rtol=1e-6, atol=1e-6)

    print("KERNEL_OK")
</pallas_src>

<mosaic_0001>
module attributes {stable_mosaic.version = 11 : i64} {
  func.func @_pe_kernel(%arg0: i32, %arg1: i32, %arg2: memref<1x1x256xf32, #tpu.memory_space<vmem>>, %arg3: memref<1x256xf32, #tpu.memory_space<vmem>>, %arg4: memref<1x1x256xf32, #tpu.memory_space<vmem>>) attributes {dimension_semantics = [#tpu.dimension_semantics<parallel>, #tpu.dimension_semantics<parallel>], iteration_bounds = array<i64: 1, 2>, scalar_prefetch = 0 : i64, scratch_operands = 0 : i64, tpu.core_type = #tpu.core_type<tc>, window_params = [{transform_indices = @transform_0, window_bounds = array<i64: 1, 1, 256>}, {transform_indices = @transform_1, window_bounds = array<i64: 1, 256>}, {transform_indices = @transform_2, window_bounds = array<i64: 1, 1, 256>}]} {
    %c0 = arith.constant 0 : index
    %c0_0 = arith.constant 0 : index
    %c0_1 = arith.constant 0 : index
    %0 = vector.load %arg2[%c0, %c0_0, %c0_1] : memref<1x1x256xf32, #tpu.memory_space<vmem>>, vector<1x1x256xf32>
    %cst = arith.constant 5.65685415 : f32
    %1 = vector.broadcast %cst : f32 to vector<1x1x256xf32>
    %2 = arith.mulf %0, %1 : vector<1x1x256xf32>
    %c0_2 = arith.constant 0 : index
    %c0_3 = arith.constant 0 : index
    %3 = vector.load %arg3[%c0_2, %c0_3] : memref<1x256xf32, #tpu.memory_space<vmem>>, vector<1x256xf32>
    %4 = vector.shape_cast %3 : vector<1x256xf32> to vector<1x1x256xf32>
    %5 = arith.addf %2, %4 : vector<1x1x256xf32>
    %c0_4 = arith.constant 0 : index
    %c0_5 = arith.constant 0 : index
    %c0_6 = arith.constant 0 : index
    %6 = vector.load %arg4[%c0_4, %c0_5, %c0_6] : memref<1x1x256xf32, #tpu.memory_space<vmem>>, vector<1x1x256xf32>
    tpu.vector_store %arg4[%c0_4, %c0_5, %c0_6], %5 {strides = array<i32>} : memref<1x1x256xf32, #tpu.memory_space<vmem>>, vector<1x1x256xf32>,
    return
  }
  func.func @transform_0(%arg0: i32, %arg1: i32) -> (i32, i32, i32) {
    %c0_i32 = arith.constant 0 : i32
    %c0_i32_0 = arith.constant 0 : i32
    return %arg1, %arg0, %c0_i32 : i32, i32, i32
  }
  func.func @transform_1(%arg0: i32, %arg1: i32) -> (i32, i32) {
    %c0_i32 = arith.constant 0 : i32
    %c0_i32_0 = arith.constant 0 : i32
    return %arg0, %c0_i32 : i32, i32
  }
  func.func @transform_2(%arg0: i32, %arg1: i32) -> (i32, i32, i32) {
    %c0_i32 = arith.constant 0 : i32
    %c0_i32_0 = arith.constant 0 : i32
    return %arg1, %arg0, %c0_i32 : i32, i32, i32
  }
}

</mosaic_0001>

<bundles_post_ra>
// kernel: tpu_custom_call.1
= control target key start
LH: loop header
LB: loop body
LE: loop exit
PB: predicated region body
PF: predicated region fallthrough
CT: control target
= control target key end

     0   :  { %7 = vsyncpa [#allocation3], 0  ;;  %s732_s0 = inlined_call_operand.hbm [shape: f32[2,1,256], index: 0, kind: input, shape index: {}]   ;;  %s733_s1 = inlined_call_operand.hbm [shape: f32[1,256], index: 1, kind: input, shape index: {}]   ;;  %s734_s2 = inlined_call_operand.hbm [shape: f32[2,1,256], index: 2, kind: output, shape index: {}]  }
   0x1   :  { %9 = vsyncpa [#allocation3 + $0x1], 0 }
   0x2   :  { %10 = vsyncpa [#allocation6], 0 }
   0x3   :  { %11 = vsyncpa [#allocation4], 0 }
   0x4   :  { %13 = vsyncpa [#allocation4 + $0x1], 0  ;;  %s571_s9 = smov 0   ;;  %s573_s10 = smov 0  }
   0x5   :  { %s575_s11 = smov 0   ;;  %s577_s12 = smov 0  }
   0x6   :  { %s579_s13 = smov 0   ;;  %s581_s14 = smov 0  }
   0x7 LB: > { %s321_s15 = sadd.s32 4294967295, %s551_s14   ;;  %s322_s16 = sadd.s32 4294967294, %s551_s14   ;;  %s551_s14 = sphi %s581_s14, %s19_s14   ;;  %s547_s13 = sphi %s579_s13, %s751_s13   ;;  %s543_s12 = sphi %s577_s12, %s750_s12   ;;  %s539_s11 = sphi %s575_s11, %s749_s11   ;;  %s535_s10 = sphi %s573_s10, %s748_s10   ;;  %s531_s9 = sphi %s571_s9, %s747_s9  }
   0x8   : > { %p53_p0 = scmp.ne.s32.totalorder %s535_s10, %s531_s9  ;;  %p605_p1 = scmp.eq.s32.totalorder %s321_s15, 0 }
   0x9   : > { %p609_p2 = scmp.eq.s32.totalorder %s321_s15, 1  ;;  %p111_p3 = scmp.eq.s32.totalorder %s322_s16, 1 }
   0xa   : > { %p615_p4 = por %p605_p1, %p53_p0  ;;  %p323_p5 = scmp.ge.s32.totalorder %s551_s14, 1 }
   0xb   : > { %p620_p6 = por %p111_p3, %p53_p0  ;;  %p118_p7 = scmp.lt.s32.totalorder %s551_s14, 3 }
   0xc   : > { %s738_s19 = scalar_select %p615_p4, 1, 0 }
   0xd   : > { %s739_s20 = scalar_select %p620_p6, 1, 0 }
   0xe   : > { %p625_p8 = pnand %p323_p5, %p118_p7  ;;  %s553_s22 = smov [#allocation5]  }
   0xf   : > { %s134_s23 = sshll.u32 %s553_s22, 4  ;;  %s28_s25 = sadd.s32 1, %s547_s13  ;;  %s135_s23 = int_to_ptr.vmem [resolvable:$true] %s134_s23 }
  0x10   : > { %p348_p10 = pneg %p625_p8  ;;  %s40_s26 = sadd.s32 1, %s539_s11 }
  0x11   : > { %p29_p12 = scmp.ge.s32.totalorder %s28_s25, 2  ;;  %s424_s27 = scalar_lea.vmem %s135_s23, 32 }
  0x12   : > { %p634_p11 = pnand %p348_p10, %p605_p1  ;;  %p425_p0 = scmp.ne.s32.totalorder %s135_s23, %s424_s27 }
  0x13   : > { %p432_p7 = scmp.lt.s32.totalorder %s135_s23, %s135_s23  ;;  %p433_p6 = scmp.lt.s32.totalorder %s424_s27, %s424_s27 }
  0x14   : > { %p415_p13 = pneg %p634_p11 }
  0x15   : > { %p434_p9 = por %p433_p6, %p432_p7 }
  0x16   : > { %p427_p3 = pnand %p425_p0, %p415_p13 }
  0x18   : > { %p428_p5 = pneg %p427_p3 }
  0x1a   : > { %p435_p4 = pnand %p434_p9, %p428_p5 }
  0x1c   : > { %438 = shalt.err (!%p435_p4)
}
  0x1d   : > { %351 = dma.hbm_to_vmem [thread:$0]  (!%p634_p11), %s733_s1, 32, %s135_s23, [#allocation6]  }
  0x1e   : > { %s753_s25 = smov (%p29_p12, %s28_s25), 0  ;;  %p47_p6 = scmp.ne.s32.totalorder %s539_s11, %s535_s10 }
  0x1f   : > { %p48_p4 = scmp.eq.s32.totalorder %s551_s14, 0  ;;  %s35_s30 = ssub.s32 %s547_s13, %s753_s25 }
  0x20   : > { %p361_p9 = scmp.lt.s32.totalorder %s551_s14, 2  ;;  %p38_p10 = scmp.eq.s32.totalorder %s35_s30, 0 }
  0x21   : > { %p49_p13 = por %p48_p4, %p47_p6  ;;  %p657_p0 = por %p609_p2, %p47_p6 }
  0x22   : > { %s145_s4 = sand.u32 1, %s539_s11   ;;  %s338_s7 = sshll.u32 %s547_s13, 5 }
  0x23   : > { %s663_s5 = scalar_select %p38_p10, %s539_s11, %s40_s26  }
  0x24   : > { %s326_s6 = sshll.u32 %s145_s4, 1  ;;  %s157_s16 = scalar_lea.hbm %s732_s0, %s338_s7 }
  0x25   : > { %s149_s22 = scalar_lea.vmem [#allocation2], %s326_s6  ;;  %p669_p11 = pnand %p361_p9, %p49_p13 }
  0x26   : > { %s159_s23 = sshll.u32 %s149_s22, 4  ;;  %s146_s18 = scalar_lea.sflag [#allocation3], %s145_s4  ;;  %s160_s23 = int_to_ptr.vmem [resolvable:$true] %s159_s23 }
  0x27   : > { %p441_p2 = pneg %p669_p11  ;;  %s452_s27 = scalar_lea.vmem %s160_s23, 32 }
  0x28   : > { %p453_p12 = scmp.ne.s32.totalorder %s160_s23, %s452_s27  ;;  %s554_s26 = smov [#allocation2]  }
  0x29   : > { %s457_s28 = sshll.u32 %s554_s26, 4  ;;  %s458_s28 = int_to_ptr.vmem [resolvable:$false] %s457_s28 }
  0x2a   : > { %p455_p3 = pnand %p453_p12, %p441_p2  ;;  %s459_s29 = scalar_lea.vmem %s458_s28, 64 }
  0x2b   : > { %p460_p7 = scmp.lt.s32.totalorder %s160_s23, %s458_s28  ;;  %p461_p6 = scmp.lt.s32.totalorder %s459_s29, %s452_s27 }
  0x2c   : > { %p456_p5 = pneg %p455_p3 }
  0x2d   : > { %p462_p4 = por %p461_p6, %p460_p7 }
  0x2f   : > { %p463_p10 = pnand %p462_p4, %p456_p5 }
  0x31   : > { %466 = shalt.err (!%p463_p10)
}
  0x32   : > { %355 = dma.hbm_to_vmem [thread:$0]  (!%p669_p11), %s157_s16, 32, %s160_s23, %s146_s18  }
  0x33   : > { %168 = sbr.rel (%p625_p8) target bundleno = 84 (0x54), region = 28  ;;  %s680_s30 = sand.u32 (!%p625_p8), 1, %s535_s10  }
  0x34   : > { %s330_s4 = sshll.u32 (!%p625_p8), %s680_s30, 1  ;;  %s171_s6 = scalar_lea.sflag (!%p625_p8), [#allocation3], %s680_s30 }
  0x35   : > { %s174_s7 = scalar_lea.vmem (!%p625_p8), [#allocation2], %s330_s4  ;;  %p744_p9 = scmp.ne.s32.totalorder (!%p625_p8), %s738_s19, 0 }
  0x38   : > { %518 = dma.done.wait (%p744_p9), %s171_s6, 32  }
  0x39   : > { %520 = vsyncadd (%p744_p9), %s171_s6, 4294967264 }
  0x3a   : > { %522 = dma.done.wait (%p605_p1), [#allocation6], 32  }
  0x3b   : > { %524 = vsyncadd (%p605_p1), [#allocation6], 4294967264  ;;  %v203_v0 = vlaneseq  ;;  %v199_v1 = vld [vmem:[%s174_s7] sm:$0x3]  ;;  %v201_v2 = vld [vmem:[#allocation5] sm:$0x3] }
  0x3c   : > { %s198_s21 = scalar_lea.vmem [#allocation7], %s330_s4  ;;  %s339_s15 = sshll.u32 %s543_s12, 5  ;;  %v200_v3 = vmul.f32 5.656854, %v199_v1 }
  0x3d   : > { %s225_s8 = sshll.u32 %s198_s21, 4  ;;  %vm205_vm0 = vcmp.lt.s32.totalorder %v203_v0, 256  ;;  %s223_s22 = scalar_lea.hbm %s734_s2, %s339_s15  ;;  %s226_s8 = int_to_ptr.vmem [resolvable:$true] %s225_s8 }
  0x3e   : > { %v202_v4 = vadd.f32 %v201_v2, %v200_v3  ;;  %s209_s17 = scalar_lea.sflag [#allocation4], %s680_s30  ;;  %s467_s23 = scalar_lea.vmem %s226_s8, 32 }
  0x3f   : > { %p468_p1 = scmp.ne.s32.totalorder %s226_s8, %s467_s23  ;;  %s555_s24 = smov [#allocation7]  }
  0x40   : > { %207 = vst.msk [vmem:[%s198_s21] sm:$0x3] %vm205_vm0, %v202_v4  ;;  %s471_s18 = sshll.u32 %s555_s24, 4  ;;  %s472_s18 = int_to_ptr.vmem [resolvable:$false] %s471_s18 }
  0x41   : > { %p469_p8 = pnand %p468_p1, %p657_p0  ;;  %s473_s27 = scalar_lea.vmem %s472_s18, 64 }
  0x42   : > { %p474_p11 = scmp.lt.s32.totalorder %s226_s8, %s472_s18  ;;  %p475_p2 = scmp.lt.s32.totalorder %s473_s27, %s467_s23 }
  0x43   : > { %p470_p13 = pneg %p469_p8 }
  0x44   : > { %p476_p12 = por %p475_p2, %p474_p11 }
  0x46   : > { %p477_p3 = pnand %p476_p12, %p470_p13 }
  0x48   : > { %480 = shalt.err (!%p477_p3)
}
  0x49   : > { %s481_s12 = scalar_lea.hbm %s223_s22, 32  ;;  %s485_s29 = scalar_lea.hbm %s734_s2, 64 }
  0x4a   : > { %p482_p5 = scmp.ne.s32.totalorder %s223_s22, %s481_s12  ;;  %p486_p4 = scmp.lt.s32.totalorder %s223_s22, %s734_s2 }
  0x4b   : > { %p487_p10 = scmp.lt.s32.totalorder %s485_s29, %s481_s12 }
  0x4c   : > { %p483_p7 = pnand %p482_p5, %p657_p0 }
  0x4d   : > { %p488_p9 = por %p487_p10, %p486_p4 }
  0x4e   : > { %p484_p6 = pneg %p483_p7 }
  0x50   : > { %p489_p1 = pnand %p488_p9, %p484_p6 }
  0x52   : > { %492 = shalt.err (!%p489_p1)
}
  0x53   : > { %346 = dma.vmem_to_hbm [thread:$0]  (%p657_p0), %s226_s8, 32, %s223_s22, %s209_s17  }
  0x54 PF: > { %s237_s6 = sand.u32 1, %s531_s9   ;;  %p745_p8 = scmp.ne.s32.totalorder %s739_s20, 0 }
  0x55   : > { %p746_p13 = scmp.ge.s32.totalorder %s551_s14, 2  ;;  %s238_s7 = scalar_lea.sflag [#allocation4], %s237_s6 }
  0x57   : > { %p357_p11 = pnand %p746_p13, %p745_p8 }
  0x59   : > { %p358_p2 = pneg %p357_p11 }
  0x5b   : > { %526 = dma.done.wait (%p358_p2), %s238_s7, 32  }
  0x5c   : > { %528 = vsyncadd (%p358_p2), %s238_s7, 4294967264  ;;  %s19_s14 = sadd.s32 1, %s551_s14   ;;  %s747_s9 = smov %s535_s10 }
  0x5d   : > { %p16_p12 = scmp.ge.s32.totalorder %s19_s14, 4   ;;  %s748_s10 = smov %s539_s11 }
  0x5e   : > { %s749_s11 = smov %s663_s5  ;;  %s750_s12 = smov %s547_s13 }
  0x5f   : > { %s751_s13 = smov %s753_s25  ;;  %18 = sbr.rel (!%p16_p12) target bundleno = 7 (0x7), region = 78 }
  0x64   :  { %243 = vsyncpa [#allocation3], 1 }
  0x65   :  { %245 = vsyncpa [#allocation3 + $0x1], 1 }
  0x66   :  { %246 = vsyncpa [#allocation6], 1 }
  0x67   :  { %247 = vsyncpa [#allocation4], 1 }
  0x68   :  { %249 = vsyncpa [#allocation4 + $0x1], 1 }

</bundles_post_ra>
